<compile_context>
chip_gen: v6e
topology: v6e:2x2x1
jax: 0.10.0
libtpu: 0.0.40
codegen_flags: <defaults>
</compile_context>

<pallas_src>
import functools

import jax
import jax.numpy as jnp
from jax.experimental import pallas as pl
from jax.experimental.pallas import tpu as pltpu


_NEG_BIG = -1e30  # finite "-inf": keeps fully-padded tiles/splits NaN-free


# ---------------------------------------------------------------------------
# helpers
# ---------------------------------------------------------------------------
def _round_up(x, m):
    return ((x + m - 1) // m) * m


def _cdiv(a, b):
    return -(-a // b)


# ---------------------------------------------------------------------------
# One-time image-table preparation (pad + bf16 cast, hoisted out of the
# per-call path).  Also picks the V tile size against a VMEM budget.
# ---------------------------------------------------------------------------
def prepare_image_table(image_vecs, *, tile_v=8192, num_splits=2,
                        vmem_tile_budget_bytes=16 * 2**20):
    V, D = image_vecs.shape
    D_pad = _round_up(D, 128)
    # Cap tv so a double-buffered bf16 (tv, D_pad) tile stays inside the budget
    # (safe for v7x's 64 MiB VMEM / 32 MiB scoped default; v5e/v6e have headroom).
    tv_cap = max(128, (vmem_tile_budget_bytes // (2 * D_pad * 2)) // 128 * 128)
    tv = max(128, min(_round_up(tile_v, 128), tv_cap, _round_up(V, 128)))
    n_tiles = _cdiv(V, tv)
    splits = max(1, min(num_splits, n_tiles))          # >= 1 tile per core split
    tiles_per_split = _cdiv(n_tiles, splits)
    V_pad = splits * tiles_per_split * tv
    table = jnp.pad(image_vecs.astype(jnp.float32),
                    ((0, V_pad - V), (0, D_pad - D))).astype(jnp.bfloat16)
    return {"table": table, "tv": tv, "splits": splits,
            "tiles_per_split": tiles_per_split,
            "V": V, "D": D, "V_pad": V_pad, "D_pad": D_pad}


# ---------------------------------------------------------------------------
# Kernel 1 (inference): logits tile = cap_proj @ img_tile.T   (V-streamed)
# ---------------------------------------------------------------------------
def _logits_kernel(capproj_ref, img_ref, out_ref):
    # capproj: (B_pad, D_pad) bf16 ; img: (tv, D_pad) bf16 ; out: (B_pad, tv) f32
    out_ref[...] = jax.lax.dot_general(
        capproj_ref[...], img_ref[...], (((1,), (1,)), ((), ())),
        preferred_element_type=jnp.float32)


# ---------------------------------------------------------------------------
# Kernel 2 (training): streaming online log-sum-exp over the image vocab.
# Grid = (core_split, v_tile); each split writes partial (m, l) that a tiny
# JAX epilogue merges.  Target-logit pick is done outside the kernel.
# ---------------------------------------------------------------------------
def _lse_kernel(capproj_ref, img_ref, m_ref, l_ref, m_sc, l_sc, *,
                tile_v, actual_v, padded_v):
    c = pl.program_id(0)          # core-split index (parallel -> both TCs on v7x)
    v = pl.program_id(1)          # V-tile index inside this split (arbitrary)
    n_v = pl.num_programs(1)

    @pl.when(v == 0)
    def _init():
        m_sc[...] = jnp.full_like(m_sc, _NEG_BIG)
        l_sc[...] = jnp.zeros_like(l_sc)

    # (B_pad, tile_v) similarity scores for this slice of the image vocab.
    s = jax.lax.dot_general(capproj_ref[...], img_ref[...],
                            (((1,), (1,)), ((), ())),
                            preferred_element_type=jnp.float32)

    def online_lse_update(scores):
        m_prev = m_sc[...]
        m_new = jnp.maximum(m_prev, jnp.max(scores, axis=-1, keepdims=True))
        alpha = jnp.exp(m_prev - m_new)
        p = jnp.exp(scores - m_new)
        l_sc[...] = alpha * l_sc[...] + jnp.sum(p, axis=-1, keepdims=True)
        m_sc[...] = m_new

    if padded_v == actual_v:
        # No padded vocab columns anywhere: mask-free hot loop.
        online_lse_update(s)
    else:
        start = (c * n_v + v) * tile_v            # global column offset of tile
        needs_mask = start + tile_v > actual_v    # only trailing tiles pay this

        @pl.when(needs_mask)
        def _masked():
            col = jax.lax.broadcasted_iota(jnp.int32, s.shape, 1) + start
            online_lse_update(jnp.where(col < actual_v, s, _NEG_BIG))

        @pl.when(jnp.logical_not(needs_mask))
        def _unmasked():
            online_lse_update(s)

    @pl.when(v == n_v - 1)
    def _finalize():
        m_ref[...] = m_sc[...]
        l_ref[...] = l_sc[...]


# ---------------------------------------------------------------------------
# Wrapper: projection (plain f32 XLA) + V-tiled retrieval (logits or CE loss)
# ---------------------------------------------------------------------------
def retrieval_forward(params, img_prep, caption_vec, labels=None):
    B, _ = caption_vec.shape
    table = img_prep["table"]
    tv, splits, tps = img_prep["tv"], img_prep["splits"], img_prep["tiles_per_split"]
    V, D = img_prep["V"], img_prep["D"]
    V_pad, D_pad = img_prep["V_pad"], img_prep["D_pad"]
    B_pad = _round_up(max(B, 8), 8)

    # Re-associated projection chain, all f32 (tiny: (B,H)@(H,F)@(F,D)); only the
    # final MXU operand is cast to bf16.
    cap_h = caption_vec.astype(jnp.float32) @ params["w_text"].T.astype(jnp.float32)
    cap_proj = cap_h @ params["w_img"].astype(jnp.float32)            # (B, D) f32
    cap_proj_p = jnp.pad(cap_proj, ((0, B_pad - B), (0, D_pad - D)))
    cap_proj_bf16 = cap_proj_p.astype(jnp.bfloat16)                   # MXU operand

    if labels is None:
        n_tiles = V_pad // tv
        logits = pl.pallas_call(
            _logits_kernel,
            out_shape=jax.ShapeDtypeStruct((B_pad, V_pad), jnp.float32),
            grid=(n_tiles,),
            in_specs=[pl.BlockSpec((B_pad, D_pad), lambda i: (0, 0)),
                      pl.BlockSpec((tv, D_pad), lambda i: (i, 0))],
            out_specs=pl.BlockSpec((B_pad, tv), lambda i: (0, i)),
            compiler_params=pltpu.CompilerParams(
                dimension_semantics=("parallel",)),
        )(cap_proj_bf16, table)
        # NOTE: padded columns (>= V) hold 0.0 (dot against zero rows), NOT -inf;
        # consumers must slice [:, :V] before any softmax over the padded buffer.
        return logits[:B, :V]

    # --- Training path: fused streaming log-sum-exp, split across core(s). ---
    m_part, l_part = pl.pallas_call(
        functools.partial(_lse_kernel, tile_v=tv, actual_v=V, padded_v=V_pad),
        out_shape=(jax.ShapeDtypeStruct((splits, B_pad, 1), jnp.float32),
                   jax.ShapeDtypeStruct((splits, B_pad, 1), jnp.float32)),
        grid=(splits, tps),
        in_specs=[pl.BlockSpec((B_pad, D_pad), lambda c, v: (0, 0)),
                  pl.BlockSpec((tv, D_pad), lambda c, v, tps=tps: (c * tps + v, 0))],
        out_specs=(pl.BlockSpec((None, B_pad, 1), lambda c, v: (c, 0, 0)),
                   pl.BlockSpec((None, B_pad, 1), lambda c, v: (c, 0, 0))),
        scratch_shapes=[pltpu.VMEM((B_pad, 1), jnp.float32),
                        pltpu.VMEM((B_pad, 1), jnp.float32)],
        compiler_params=pltpu.CompilerParams(
            dimension_semantics=("parallel", "arbitrary")),
    )(cap_proj_bf16, table)

    # Merge per-split partial (m, l) into the full log-sum-exp (tiny epilogue).
    m_comb = jnp.max(m_part, axis=0)                                  # (B_pad, 1)
    l_comb = jnp.sum(l_part * jnp.exp(m_part - m_comb), axis=0)       # (B_pad, 1)
    lse = (m_comb + jnp.log(l_comb))[:B, 0]                           # (B,)

    # Target logit via a tiny XLA gather + dot (same bf16 operands as the kernel).
    target_rows = table[labels]                                       # (B, D_pad) bf16
    picked = jnp.einsum("bd,bd->b", cap_proj_bf16[:B], target_rows,
                        preferred_element_type=jnp.float32)
    # nn.CrossEntropyLoss default reduction='mean' over the real batch rows.
    return jnp.mean(lse - picked)


# ---------------------------------------------------------------------------
# Glue: a minimal deterministic "bert" stand-in (embedding + masked mean pool
# + tanh pooler) that yields the pooled output [-1] used by the module.
# ---------------------------------------------------------------------------
# TODO(synk): full BERT transformer encoder not implemented; stand-in pooled encoder only.
def bert_stub(params, input_ids, input_masks, segment_ids):
    emb = params["tok_emb"][input_ids] + params["seg_emb"][segment_ids]      # (B, S, H)
    mask = input_masks.astype(jnp.float32)[..., None]                        # (B, S, 1)
    pooled = jnp.sum(emb * mask, axis=1) / jnp.maximum(jnp.sum(mask, axis=1), 1.0)
    pooled = jnp.tanh(pooled @ params["pooler_w"].T)                         # (B, H)
    return pooled


def caption_image_retriever_forward(params, img_prep, caption_input_ids,
                                    caption_segment_ids, caption_input_masks,
                                    labels=None):
    caption_vec = bert_stub(params, caption_input_ids, caption_input_masks,
                            caption_segment_ids)                             # (B, H)
    return retrieval_forward(params, img_prep, caption_vec, labels)


# Pure-JAX reference (f32) for a light sanity check.
def _reference_forward(params, caption_vec, labels=None):
    cap_h = caption_vec @ params["w_text"].T
    img_h = params["image_vecs"] @ params["w_img"].T
    logits = cap_h @ img_h.T
    if labels is None:
        return logits
    m = jnp.max(logits, axis=-1, keepdims=True)
    lse = m[:, 0] + jnp.log(jnp.sum(jnp.exp(logits - m), axis=-1))
    picked = jnp.take_along_axis(logits, labels[:, None], axis=-1)[:, 0]
    return jnp.mean(lse - picked)


# ---------------------------------------------------------------------------
# Deterministic parameter construction
# ---------------------------------------------------------------------------
def make_params(key, *, vocab_size, hidden_size, feature_dim, img_vocab, img_dim):
    ks = jax.random.split(key, 6)
    raw_img = jax.random.normal(ks[0], (img_vocab, img_dim), jnp.float32) * 0.1
    image_vecs = jnp.zeros((img_vocab + 1, img_dim), jnp.float32).at[1:].set(raw_img)
    return {
        "tok_emb": jax.random.normal(ks[1], (vocab_size, hidden_size), jnp.float32) * 0.02,
        "seg_emb": jax.random.normal(ks[2], (2, hidden_size), jnp.float32) * 0.02,
        "pooler_w": jax.random.normal(ks[3], (hidden_size, hidden_size), jnp.float32) * 0.05,
        "w_text": jax.random.normal(ks[4], (feature_dim, hidden_size), jnp.float32) * 0.05,
        "w_img": jax.random.normal(ks[5], (feature_dim, img_dim), jnp.float32) * 0.05,
        "image_vecs": image_vecs,
    }


if __name__ == "__main__":
    B, S = 2, 8
    HIDDEN, FEAT = 32, 32
    VOCAB = 50
    IMG_VOCAB, IMG_DIM = 300, 24          # table becomes (301, 24) with zero pad row

    key = jax.random.PRNGKey(0)
    k_ids, k_lbl, k_par = jax.random.split(key, 3)

    params = make_params(k_par, vocab_size=VOCAB, hidden_size=HIDDEN,
                         feature_dim=FEAT, img_vocab=IMG_VOCAB, img_dim=IMG_DIM)

    # One-time image-table prep (pad + bf16 cast).  Tiny tile_v here so the demo
    # exercises a multi-tile V grid, the padded-column mask gating, and the
    # 2-way core split; production uses the default tile_v=8192 (~16384 on v7x).
    img_prep = prepare_image_table(params["image_vecs"], tile_v=128, num_splits=2)

    caption_input_ids = jax.random.randint(k_ids, (B, S), 1, VOCAB, dtype=jnp.int32)
    caption_segment_ids = jnp.zeros((B, S), jnp.int32)
    caption_input_masks = jnp.ones((B, S), jnp.int32)
    labels = jax.random.randint(k_lbl, (B,), 0, IMG_VOCAB + 1, dtype=jnp.int32)

    # Inference path: similarity logits (B, V)
    logits = caption_image_retriever_forward(params, img_prep, caption_input_ids,
                                             caption_segment_ids, caption_input_masks)
    logits = jax.block_until_ready(logits)
    assert logits.shape == (B, IMG_VOCAB + 1)

    # Training path: scalar cross-entropy loss (streamed online-LSE kernel)
    loss = caption_image_retriever_forward(params, img_prep, caption_input_ids,
                                           caption_segment_ids, caption_input_masks,
                                           labels=labels)
    loss = jax.block_until_ready(loss)
    assert loss.shape == ()

    # light numeric sanity check vs. f32 reference (bf16 MXU operands -> modest tol)
    cap_vec = bert_stub(params, caption_input_ids, caption_input_masks,
                        caption_segment_ids)
    ref_logits = _reference_forward(params, cap_vec)
    ref_loss = _reference_forward(params, cap_vec, labels)
    assert jnp.allclose(logits, ref_logits, atol=2e-2, rtol=2e-2)
    assert jnp.allclose(loss, ref_loss, atol=2e-2, rtol=2e-2)

    print("KERNEL_OK")
</pallas_src>

<mosaic_0001>
module attributes {stable_mosaic.version = 11 : i64} {
  func.func @_logits_kernel(%arg0: i32, %arg1: memref<8x128xbf16, #tpu.memory_space<vmem>>, %arg2: memref<128x128xbf16, #tpu.memory_space<vmem>>, %arg3: memref<8x128xf32, #tpu.memory_space<vmem>>) attributes {dimension_semantics = [#tpu.dimension_semantics<parallel>], iteration_bounds = array<i64: 4>, scalar_prefetch = 0 : i64, scratch_operands = 0 : i64, tpu.core_type = #tpu.core_type<tc>, window_params = [{pipeline_mode = #tpu.pipeline_mode<synchronous>, transform_indices = @transform_0, window_bounds = array<i64: 8, 128>}, {transform_indices = @transform_1, window_bounds = array<i64: 128, 128>}, {transform_indices = @transform_2, window_bounds = array<i64: 8, 128>}]} {
    %c0 = arith.constant 0 : index
    %c0_0 = arith.constant 0 : index
    %0 = vector.load %arg1[%c0, %c0_0] : memref<8x128xbf16, #tpu.memory_space<vmem>>, vector<8x128xbf16>
    %c0_1 = arith.constant 0 : index
    %c0_2 = arith.constant 0 : index
    %1 = vector.load %arg2[%c0_1, %c0_2] : memref<128x128xbf16, #tpu.memory_space<vmem>>, vector<128x128xbf16>
    %cst = arith.constant dense<0.000000e+00> : vector<8x128xf32>
    %2 = tpu.matmul %0, %1, %cst {dimension_numbers = #tpu.dot_dimension_numbers<[1], [1], [0], [0], [0, 0, 1, 0], [], []>} : vector<8x128xbf16>, vector<128x128xbf16>, vector<8x128xf32> -> vector<8x128xf32>
    %c0_3 = arith.constant 0 : index
    %c0_4 = arith.constant 0 : index
    %3 = vector.load %arg3[%c0_3, %c0_4] : memref<8x128xf32, #tpu.memory_space<vmem>>, vector<8x128xf32>
    tpu.vector_store %arg3[%c0_3, %c0_4], %2 {strides = array<i32>} : memref<8x128xf32, #tpu.memory_space<vmem>>, vector<8x128xf32>,
    return
  }
  func.func @transform_0(%arg0: i32) -> (i32, i32) {
    %c0_i32 = arith.constant 0 : i32
    %c0_i32_0 = arith.constant 0 : i32
    %c0_i32_1 = arith.constant 0 : i32
    return %c0_i32, %c0_i32_0 : i32, i32
  }
  func.func @transform_1(%arg0: i32) -> (i32, i32) {
    %c0_i32 = arith.constant 0 : i32
    %c0_i32_0 = arith.constant 0 : i32
    return %arg0, %c0_i32 : i32, i32
  }
  func.func @transform_2(%arg0: i32) -> (i32, i32) {
    %c0_i32 = arith.constant 0 : i32
    %c0_i32_0 = arith.constant 0 : i32
    return %c0_i32, %arg0 : i32, i32
  }
}

</mosaic_0001>

<bundles_post_ra>
// kernel: tpu_custom_call.1
= control target key start
LH: loop header
LB: loop body
LE: loop exit
PB: predicated region body
PF: predicated region fallthrough
CT: control target
= control target key end

     0   :  { %7 = vsyncpa [#allocation3], 0  ;;  %s825_s0 = inlined_call_operand.hbm [shape: bf16[8,128], index: 0, kind: input, shape index: {}]   ;;  %s826_s1 = inlined_call_operand.hbm [shape: bf16[512,128], index: 1, kind: input, shape index: {}]   ;;  %s827_s2 = inlined_call_operand.hbm [shape: f32[8,512], index: 2, kind: output, shape index: {}]  }
   0x1   :  { %8 = vsyncpa [#allocation6], 0 }
   0x2   :  { %10 = vsyncpa [#allocation6 + $0x1], 0 }
   0x3   :  { %11 = vsyncpa [#allocation4], 0 }
   0x4   :  { %13 = vsyncpa [#allocation4 + $0x1], 0  ;;  %s647_s9 = smov 0   ;;  %s649_s10 = smov 0  }
   0x5   :  { %s651_s11 = smov 0   ;;  %s653_s12 = smov 0  }
   0x6 LB: > { %s668_s13 = sadd.s32 4294967295, %s623_s12   ;;  %s379_s14 = sadd.s32 4294967294, %s623_s12   ;;  %s623_s12 = sphi %s653_s12, %s848_s12   ;;  %s619_s11 = sphi %s651_s11, %s847_s11   ;;  %s615_s10 = sphi %s649_s10, %s846_s10   ;;  %s611_s9 = sphi %s647_s9, %s845_s9  }
   0x7   : > { %s672_s15 = sadd.s32 1, %s623_s12   ;;  %s47_s16 = sadd.s32 1, %s619_s11 }
   0x8   : > { %s44_s17 = ssub.s32 %s623_s12, %s672_s15  ;;  %p54_p0 = scmp.ne.s32.totalorder %s619_s11, %s615_s10 }
   0x9   : > { %p45_p1 = scmp.eq.s32.totalorder %s44_s17, 0  ;;  %p55_p2 = scmp.eq.s32.totalorder %s623_s12, 0 }
   0xa   : > { %p60_p3 = scmp.ne.s32.totalorder %s615_s10, %s611_s9  ;;  %p829_p4 = scmp.eq.s32.totalorder %s668_s13, 0 }
   0xb   : > { %s684_s18 = scalar_select %p45_p1, %s619_s11, %s47_s16  }
   0xc   : > { %p686_p5 = por %p55_p2, %p54_p0  ;;  %p692_p6 = por %p829_p4, %p60_p3 }
   0xd   : > { %p84_p7 = scmp.eq.s32.totalorder %s668_s13, 3  ;;  %p90_p8 = scmp.eq.s32.totalorder %s379_s14, 3 }
   0xe   : > { %s833_s20 = scalar_select %p692_p6, 1, 0 }
   0xf   : > { %p380_p9 = scmp.ge.s32.totalorder %s623_s12, 1  ;;  %p97_p10 = scmp.lt.s32.totalorder %s623_s12, 5 }
  0x10   : > { %p699_p11 = por %p84_p7, %p54_p0  ;;  %p703_p12 = por %p90_p8, %p60_p3 }
  0x11   : > { %p707_p13 = pnand %p380_p9, %p97_p10  ;;  %s625_s24 = smov [#allocation2]  }
  0x12   : > { %s834_s21 = scalar_select %p699_p11, 1, 0 }
  0x13   : > { %s835_s22 = scalar_select %p703_p12, 1, 0 }
  0x14   : > { %s836_s23 = scalar_select %p707_p13, 1, 0 }
  0x15   : > { %p440_p1 = pneg %p707_p13  ;;  %s110_s25 = sshll.u32 %s625_s24, 4  ;;  %s111_s25 = int_to_ptr.vmem [resolvable:$true] %s110_s25 }
  0x16   : > { %p453_p2 = scmp.lt.s32.totalorder %s623_s12, 4  ;;  %s121_s27 = sand.u32 1, %s619_s11  }
  0x17   : > { %p716_p0 = pnand %p440_p1, %p829_p4  ;;  %s383_s29 = sshll.u32 %s121_s27, 6 }
  0x18   : > { %p723_p3 = pnand %p453_p2, %p686_p5  ;;  %s512_s30 = scalar_lea.vmem %s111_s25, 64 }
  0x19   : > { %p503_p7 = pneg %p716_p0  ;;  %p513_p8 = scmp.ne.s32.totalorder %s111_s25, %s512_s30 }
  0x1a   : > { %p520_p12 = scmp.lt.s32.totalorder %s111_s25, %s111_s25  ;;  %p521_p11 = scmp.lt.s32.totalorder %s512_s30, %s512_s30 }
  0x1b   : > { %p515_p9 = pnand %p513_p8, %p503_p7 }
  0x1c   : > { %p522_p1 = por %p521_p11, %p520_p12 }
  0x1d   : > { %p516_p10 = pneg %p515_p9 }
  0x1f   : > { %p523_p4 = pnand %p522_p1, %p516_p10 }
  0x21   : > { %526 = shalt.err (!%p523_p4)
}
  0x22   : > { %443 = dma.hbm_to_vmem [thread:$0]  (!%p716_p0), %s825_s0, 64, %s111_s25, [#allocation3]  }
  0x23   : > { %s402_s5 = sshll.u32 %s623_s12, 10  ;;  %s125_s6 = scalar_lea.vmem [#allocation5], %s383_s29 }
  0x24   : > { %s132_s7 = sshll.u32 %s125_s6, 4  ;;  %s738_s16 = scalar_lea.hbm %s826_s1, %s402_s5  ;;  %s740_s7 = int_to_ptr.vmem [resolvable:$true] %s132_s7 }
  0x25   : > { %s742_s17 = scalar_lea.sflag [#allocation6], %s121_s27  ;;  %s527_s19 = scalar_lea.hbm %s738_s16, 1024 }
  0x26   : > { %p528_p4 = scmp.ne.s32.totalorder %s738_s16, %s527_s19  ;;  %p529_p5 = pneg %p723_p3 }
  0x27   : > { %s532_s26 = scalar_lea.hbm %s826_s1, 4096  ;;  %p533_p2 = scmp.lt.s32.totalorder %s738_s16, %s826_s1 }
  0x28   : > { %p530_p11 = pnand %p529_p5, %p528_p4  ;;  %p534_p0 = scmp.lt.s32.totalorder %s532_s26, %s527_s19 }
  0x2a   : > { %p531_p12 = pneg %p530_p11  ;;  %p535_p7 = por %p534_p0, %p533_p2 }
  0x2c   : > { %p536_p8 = pnand %p535_p7, %p531_p12 }
  0x2e   : > { %539 = shalt.err (!%p536_p8)
}
  0x2f   : > { %s540_s27 = scalar_lea.vmem %s740_s7, 1024  ;;  %s626_s3 = smov [#allocation5]  }
  0x30   : > { %p541_p9 = scmp.ne.s32.totalorder %s740_s7, %s540_s27  ;;  %s545_s4 = sshll.u32 %s626_s3, 4  ;;  %s546_s4 = int_to_ptr.vmem [resolvable:$false] %s545_s4 }
  0x31   : > { %s547_s5 = scalar_lea.vmem %s546_s4, 2048  ;;  %p548_p4 = scmp.lt.s32.totalorder %s740_s7, %s546_s4 }
  0x32   : > { %p543_p10 = pnand %p541_p9, %p529_p5  ;;  %p549_p11 = scmp.lt.s32.totalorder %s547_s5, %s540_s27 }
  0x34   : > { %p544_p1 = pneg %p543_p10  ;;  %p550_p6 = por %p549_p11, %p548_p4 }
  0x36   : > { %p551_p13 = pnand %p550_p6, %p544_p1 }
  0x38   : > { %554 = shalt.err (!%p551_p13)
}
  0x39   : > { %s627_s6 = smov 64   ;;  %s628_s8 = smov 4  }
  0x3a   : > { %447 = dma.hbm_to_vmem [thread:$0]  (!%p723_p3), %s738_s16, 1024, %s740_s7, %s742_s17, %s627_s6, %s627_s6, %s628_s8  }
  0x3b   : > { %p839_p5 = scmp.ne.s32.totalorder %s836_s23, 0 }
  0x3c   : > { %p840_p12 = scmp.eq.s32.totalorder (!%p839_p5), %s668_s13, 0 }
  0x3d   : > { %144 = sbr.rel (%p839_p5) target bundleno = 345 (0x159), region = 28 }
  0x42   : > { %598 = dma.done.wait (%p840_p12), [#allocation3], 64   ;;  %p841_p2 = pmov %p840_p12 }
  0x43   : > { %s770_s14 = sand.u32 1, %s615_s10   ;;  %p842_p6 = scmp.ne.s32.totalorder %s833_s20, 0 }
  0x44   : > { %600 = vsyncadd (%p841_p2), [#allocation3], 4294967232  ;;  %s388_s19 = sshll.u32 %s770_s14, 6  ;;  %s151_s24 = scalar_lea.sflag [#allocation6], %s770_s14 }
  0x45   : > { %s154_s25 = scalar_lea.vmem [#allocation5], %s388_s19 }
  0x46   : > { %602 = dma.done.wait (%p842_p6), %s151_s24, 1024  }
  0x47   : > { %604 = vsyncadd (%p842_p6), %s151_s24, 4294966272  ;;  %v629_v0 = vmov 0.0   ;;  %vm630_vm0 = vmmov 0   ;;  %v493_v1 = vld [vmem:[%s154_s25 + $0x38] sm:$0xff]   ;;  %v494_v2 = vld [vmem:[%s154_s25 + $0x30] sm:$0xff]   ;;  %s389_s20 = sshll.u32 %s770_s14, 3 }
  0x48   : > { %412 = vmatprep.subr.bf16.mxu0 %v629_v0  ;;  %428 = vmatprep.mubr.msk.bf16.mxu0 %vm630_vm0, %v629_v0  ;;  %v495_v3 = vld [vmem:[%s154_s25 + $0x28] sm:$0xff]   ;;  %v496_v4 = vld [vmem:[%s154_s25 + $0x20] sm:$0xff]   ;;  %v497_v5 = vld [vmem:[%s154_s25 + $0x18] sm:$0xff]   ;;  %s174_s23 = scalar_lea.vmem [#allocation7], %s389_s20  ;;  %s399_s7 = sshll.u32 %s668_s13, 7 }
  0x49   : > { %413 = vmatpush3.bf16.xpose.msra.mxu0 %v493_v1  ;;  %v498_v6 = vld [vmem:[%s154_s25 + $0x10] sm:$0xff]   ;;  %v499_v7 = vld [vmem:[%s154_s25 + $0x8] sm:$0xff]   ;;  %v500_v8 = vld [vmem:[%s154_s25] sm:$0xff]   ;;  %s297_s28 = sshll.u32 %s174_s23, 4  ;;  %s785_s26 = scalar_lea.hbm %s827_s2, %s399_s7  ;;  %s780_s28 = int_to_ptr.vmem [resolvable:$true] %s297_s28 }
  0x4a   : > { %414 = vmatprep.subr.bf16.mxu0 %v629_v0  ;;  %v177_v9 = vld [vmem:[#allocation2] sm:$0xf]  ;;  %s284_s29 = scalar_lea.sflag [#allocation4], %s770_s14  ;;  %s555_s30 = scalar_lea.vmem %s780_s28, 128 }
  0x4b   : > { %p556_p13 = scmp.ne.s32.totalorder %s780_s28, %s555_s30  ;;  %p843_p3 = scmp.ne.s32.totalorder %s834_s21, 0 }
  0x4c   : > { %s631_s13 = smov [#allocation7]  }
  0x4d   : > { %p557_p0 = pnand %p556_p13, %p843_p3  ;;  %s559_s27 = sshll.u32 %s631_s13, 4  ;;  %s560_s27 = int_to_ptr.vmem [resolvable:$false] %s559_s27 }
  0x4e   : > { %s561_s3 = scalar_lea.vmem %s560_s27, 256  ;;  %p562_p8 = scmp.lt.s32.totalorder %s780_s28, %s560_s27 }
  0x4f   : > { %p558_p7 = pneg %p557_p0  ;;  %p563_p9 = scmp.lt.s32.totalorder %s561_s3, %s555_s30 }
  0x51   : > { %415 = vmatpush3.bf16.xpose.msra.mxu0 %v494_v2  ;;  %p564_p10 = por %p563_p9, %p562_p8 }
  0x52   : > { %416 = vmatprep.subr.bf16.mxu0 %v629_v0 }
  0x53   : > { %p565_p1 = pnand %p564_p10, %p558_p7 }
  0x59   : > { %417 = vmatpush3.bf16.xpose.msra.mxu0 %v495_v3 }
  0x5a   : > { %418 = vmatprep.subr.bf16.mxu0 %v629_v0 }
  0x61   : > { %419 = vmatpush3.bf16.xpose.msra.mxu0 %v496_v4 }
  0x62   : > { %420 = vmatprep.subr.bf16.mxu0 %v629_v0 }
  0x69   : > { %421 = vmatpush3.bf16.xpose.msra.mxu0 %v497_v5 }
  0x6a   : > { %422 = vmatprep.subr.bf16.mxu0 %v629_v0 }
  0x71   : > { %423 = vmatpush3.bf16.xpose.msra.mxu0 %v498_v6 }
  0x72   : > { %424 = vmatprep.subr.bf16.mxu0 %v629_v0 }
  0x79   : > { %425 = vmatpush3.bf16.xpose.msra.mxu0 %v499_v7 }
  0x7a   : > { %426 = vmatprep.subr.bf16.mxu0 %v629_v0 }
  0x81   : > { %427 = vmatpush3.bf16.xpose.msra.mxu0 %v500_v8 }
  0x88   : > { %429 = vmatmul.mubr.bf16.vlgmr.msra.gmra.mxu0 %v177_v9 }
 0x148   : > { %v276_v10 = vpop.f32.mrf.mxu0 }
 0x149   : > { %282 = vst [vmem:[%s174_s23] sm:$0xff] %v276_v10 }
 0x14a   : > { %v430_v11 = vpop.f32.mrf.mxu0 }
 0x14b   : > { %568 = shalt.err (!%p565_p1)
}
 0x14c   : > { %s569_s4 = scalar_lea.hbm %s785_s26, 128  ;;  %s573_s8 = scalar_lea.hbm %s827_s2, 512 }
 0x14d   : > { %p570_p4 = scmp.ne.s32.totalorder %s785_s26, %s569_s4  ;;  %p574_p12 = scmp.lt.s32.totalorder %s785_s26, %s827_s2 }
 0x14e   : > { %p575_p2 = scmp.lt.s32.totalorder %s573_s8, %s569_s4 }
 0x14f   : > { %p571_p11 = pnand %p570_p4, %p843_p3 }
 0x150   : > { %p576_p6 = por %p575_p2, %p574_p12 }
 0x151   : > { %p572_p5 = pneg %p571_p11 }
 0x153   : > { %p577_p13 = pnand %p576_p6, %p572_p5 }
 0x155   : > { %580 = shalt.err (!%p577_p13)
}
 0x156   : > { %438 = dma.vmem_to_hbm [thread:$0]  (%p843_p3), %s780_s28, 128, %s785_s26, %s284_s29   ;;  %v279_v12 = vpop.f32.mrf.mxu0 }
 0x158   : > { %v431_v13 = vpop.f32.mrf.mxu0 }
 0x159 PF: > { %p455_p0 = scmp.ge.s32.totalorder %s623_s12, 2  ;;  %s309_s24 = sand.u32 1, %s611_s9  }
 0x15a   : > { %p844_p7 = scmp.ne.s32.totalorder %s835_s22, 0  ;;  %s310_s25 = scalar_lea.sflag [#allocation4], %s309_s24 }
 0x15c   : > { %p449_p8 = pnand %p455_p0, %p844_p7 }
 0x15e   : > { %p450_p9 = pneg %p449_p8 }
 0x160   : > { %606 = dma.done.wait (%p450_p9), %s310_s25, 128  }
 0x161   : > { %608 = vsyncadd (%p450_p9), %s310_s25, 4294967168  ;;  %p16_p3 = scmp.ge.s32.totalorder %s672_s15, 6   ;;  %s845_s9 = smov %s615_s10 }
 0x162   : > { %s846_s10 = smov %s619_s11  ;;  %s847_s11 = smov %s684_s18 }
 0x163   : > { %s848_s12 = smov %s672_s15  ;;  %18 = sbr.rel (!%p16_p3) target bundleno = 6 (0x6), region = 78 }
 0x168   :  { %315 = vsyncpa [#allocation3], 1 }
 0x169   :  { %317 = vsyncpa [#allocation3 + $0x1], 1 }
 0x16a   :  { %318 = vsyncpa [#allocation6], 1 }
 0x16b   :  { %320 = vsyncpa [#allocation6 + $0x1], 1 }
 0x16c   :  { %321 = vsyncpa [#allocation4], 1 }
 0x16d   :  { %323 = vsyncpa [#allocation4 + $0x1], 1 }

</bundles_post_ra>
